<compile_context>
chip_gen: v7x
topology: tpu7x:2x2x1
jax: 0.10.0
libtpu: 0.0.40
codegen_flags: <defaults>
</compile_context>

<pallas_src>
from functools import partial

import numpy as np
import jax
import jax.numpy as jnp
from jax import lax
from jax.experimental import pallas as pl
from jax.experimental.pallas import tpu as pltpu

N_MAX = 128  # fixed capacity (max number of nodes the kernel supports)


# ----------------------------- Pallas kernels ------------------------------
def _make_er_kernel(undirected: bool):
    """Build an ER edge-sampling kernel specialized on directed/undirected."""

    def kernel(n_ref, r_ref, u_ref, adj_ref):
        # n_ref:   SMEM int32[B]              nodes per graph (<= N_MAX)
        # r_ref:   SMEM f32[B]                edge probability per graph
        # u_ref:   VMEM f32[1, N_MAX, N_MAX]  uniform randoms in [0, 1)
        # adj_ref: VMEM f32[1, N_MAX, N_MAX]  dense adjacency (zero-padded)
        b = pl.program_id(0)
        n = n_ref[b]
        r = r_ref[b]
        u = u_ref[0]

        rows = lax.broadcasted_iota(jnp.int32, (N_MAX, N_MAX), 0)
        cols = lax.broadcasted_iota(jnp.int32, (N_MAX, N_MAX), 1)

        if undirected:
            # rows < cols already implies rows != cols, and with cols < n it
            # implies rows < n -> single fused predicate, one select.
            keep = (u <= r) & (rows < cols) & (cols < n)
            upper = jnp.where(keep, 1.0, 0.0).astype(jnp.float32)
            adj_ref[0] = upper + upper.T  # mirror strict upper triangle
        else:
            keep = (u <= r) & (rows != cols) & (rows < n) & (cols < n)
            adj_ref[0] = jnp.where(keep, 1.0, 0.0).astype(jnp.float32)

    return kernel


@partial(jax.jit, static_argnames=("undirected",))
def sample_dense_adj_batch(key, n, r, *, undirected=True):
    """Sample B padded dense ER adjacencies on device.

    n: int32[B] node counts (<= N_MAX), r: float32[B] edge probabilities.
    Returns float32[B, N_MAX, N_MAX], zero outside [:n, :n] for each graph.
    """
    batch = n.shape[0]
    u = jax.random.uniform(key, (batch, N_MAX, N_MAX), dtype=jnp.float32)
    return pl.pallas_call(
        _make_er_kernel(undirected),
        out_shape=jax.ShapeDtypeStruct((batch, N_MAX, N_MAX), jnp.float32),
        grid=(batch,),
        in_specs=[
            pl.BlockSpec(memory_space=pltpu.MemorySpace.SMEM),        # n  (int32[B])
            pl.BlockSpec(memory_space=pltpu.MemorySpace.SMEM),        # r  (f32[B])
            pl.BlockSpec((1, N_MAX, N_MAX), lambda b: (b, 0, 0)),      # uniforms
        ],
        out_specs=pl.BlockSpec((1, N_MAX, N_MAX), lambda b: (b, 0, 0)),
        compiler_params=pltpu.CompilerParams(dimension_semantics=("parallel",)),
    )(n.astype(jnp.int32), r.astype(jnp.float32), u)


@partial(jax.jit, static_argnames=("undirected",))
def _sample_single(key, logits, n_vals, r_vals, *, undirected=True):
    """One graph: draw N ~ empirical dist, look up r, sample edges (all on device)."""
    key_n, key_e = jax.random.split(key)
    idx = jax.random.categorical(key_n, logits)
    n = n_vals[idx].astype(jnp.int32)
    r = r_vals[idx].astype(jnp.float32)
    adj = sample_dense_adj_batch(key_e, n[None], r[None], undirected=undirected)
    return adj[0], n


# ----------------------------- Baseline model ------------------------------
class BaselineER:
    """JAX/Pallas port of the Erdős-Rényi Baseline module."""

    def __init__(self, batch_vec, edge_index, num_graphs):
        self.N_dist, self.r_dist = self._compute_graph_statistics(
            np.asarray(batch_vec), np.asarray(edge_index), num_graphs
        )
        # Device-resident copies used by the jitted sampling path.
        self._logits = jnp.log(jnp.asarray(self.N_dist[1], dtype=jnp.float32))
        self._n_vals = jnp.asarray(self.N_dist[0], dtype=jnp.int32)
        self._r_vals = jnp.asarray(self.r_dist[1], dtype=jnp.float32)

    @staticmethod
    def _compute_graph_statistics(batch_vec, edge_index, num_graphs):
        total_nodes = batch_vec.shape[0]
        graph_idxs = np.arange(num_graphs)[:, None]                # (G, 1)
        mask = (batch_vec[None, :] == graph_idxs)                  # (G, total_nodes)
        nodes_per_graph = mask.sum(1)                              # (G,)

        n_vals, n_counts = np.unique(nodes_per_graph, return_counts=True)
        N_dist = np.vstack([n_vals, n_counts]).astype(np.float64)  # (2, K)

        src_deg = np.bincount(edge_index[0], minlength=total_nodes)        # per-node out-degree
        src_counts = (src_deg[None, :] * mask.astype(np.float64)).sum(1)   # directed edges / graph
        edge_probs_unif = src_counts / (nodes_per_graph * (nodes_per_graph - 1))

        probs_given_N = (
            edge_probs_unif[None, :]
            * (nodes_per_graph[None, :] == N_dist[0][:, None]).astype(np.float64)
        ).sum(1) / N_dist[1]

        r_dist = np.vstack([N_dist[0], probs_given_N])
        N_dist = N_dist.copy()
        N_dist[1] /= num_graphs
        return N_dist, r_dist

    def forward(self, key, batch_size=1, undirected=True, return_adj=False):
        assert batch_size == 1, "Batched sampling not implemented!"

        # Single jitted dispatch: categorical N draw, r lookup, Pallas edge
        # sampling.  One host sync afterwards to learn N (output shape is
        # data dependent, exactly like the original module).
        adj_full, n = _sample_single(
            key, self._logits, self._n_vals, self._r_vals, undirected=undirected
        )
        adj_full, n = jax.block_until_ready((adj_full, n))
        N = int(n)

        if return_adj:
            return adj_full[:N, :N][None]  # (1, N, N) — matches to_dense_adj

        # Sparse edge_index extracted on host (data-dependent shape).
        adj_np = np.asarray(adj_full)[:N, :N]
        src, dst = np.nonzero(adj_np)
        return np.stack([src, dst]).astype(np.int64)


# ---------------------- synthetic deterministic dataset --------------------
def make_synthetic_dataset(key):
    """Build a small batched graph dataset (batch vector + edge_index)."""
    node_counts = [8, 8, 12, 12, 12, 16, 16, 16]
    num_graphs = len(node_counts)
    batch_vec, srcs, dsts = [], [], []
    offset = 0
    for g, n in enumerate(node_counts):
        batch_vec.extend([g] * n)
        key, sub = jax.random.split(key)
        # undirected ER with p=0.3 over the strict upper triangle
        draws = np.asarray(jax.random.uniform(sub, (n, n)))
        for i in range(n):
            for j in range(i + 1, n):
                if draws[i, j] < 0.3:
                    srcs.extend([offset + i, offset + j])
                    dsts.extend([offset + j, offset + i])
        offset += n
    batch_vec = np.asarray(batch_vec, dtype=np.int64)
    edge_index = np.asarray([srcs, dsts], dtype=np.int64)
    return batch_vec, edge_index, num_graphs


if __name__ == "__main__":
    key = jax.random.PRNGKey(0)
    key_data, key_fwd1, key_fwd2, key_fwd3, key_batch = jax.random.split(key, 5)

    batch_vec, edge_index, num_graphs = make_synthetic_dataset(key_data)
    model = BaselineER(batch_vec, edge_index, num_graphs)

    # --- undirected forward, dense adjacency from the kernel ---
    adj = model.forward(key_fwd1, batch_size=1, undirected=True, return_adj=True)
    a = np.asarray(adj[0])
    assert a.shape[0] == a.shape[1]
    assert np.allclose(a, a.T)
    assert np.allclose(np.diag(a), 0.0)
    assert set(np.unique(a)).issubset({0.0, 1.0})

    # --- sparse edge_index return path ---
    ei = model.forward(key_fwd2, batch_size=1, undirected=True, return_adj=False)
    assert ei.shape[0] == 2

    # --- directed kernel variant ---
    adj_d = model.forward(key_fwd3, batch_size=1, undirected=False, return_adj=True)
    d = np.asarray(adj_d[0])
    assert np.allclose(np.diag(d), 0.0)
    assert set(np.unique(d)).issubset({0.0, 1.0})

    # --- batched padded sampling (grid over graphs, parallel axis) ---
    n_b = jnp.asarray([8, 12, 16, 16], dtype=jnp.int32)
    r_b = jnp.asarray([0.3, 0.25, 0.2, 0.5], dtype=jnp.float32)
    adj_b = jax.block_until_ready(
        sample_dense_adj_batch(key_batch, n_b, r_b, undirected=True)
    )
    ab = np.asarray(adj_b)
    assert ab.shape == (4, N_MAX, N_MAX)
    assert np.all(ab[0, 8:, :] == 0.0) and np.all(ab[0, :, 8:] == 0.0)
    for g in range(4):
        assert np.allclose(ab[g], ab[g].T)
        assert np.allclose(np.diag(ab[g]), 0.0)

    print("KERNEL_OK")
</pallas_src>

<mosaic_0001>
module attributes {stable_mosaic.version = 11 : i64} {
  func.func @kernel(%arg0: i32, %arg1: memref<1xi32, #tpu.memory_space<smem>>, %arg2: memref<1xf32, #tpu.memory_space<smem>>, %arg3: memref<1x128x128xf32, #tpu.memory_space<vmem>>, %arg4: memref<1x128x128xf32, #tpu.memory_space<vmem>>) attributes {dimension_semantics = [#tpu.dimension_semantics<parallel>], iteration_bounds = array<i64: 1>, scalar_prefetch = 0 : i64, scratch_operands = 0 : i64, tpu.core_type = #tpu.core_type<tc>, window_params = [{transform_indices = @transform_0, window_bounds = array<i64: 1>}, {transform_indices = @transform_1, window_bounds = array<i64: 1>}, {transform_indices = @transform_2, window_bounds = array<i64: 1, 128, 128>}, {transform_indices = @transform_3, window_bounds = array<i64: 1, 128, 128>}]} {
    %0 = arith.index_cast %arg0 : i32 to index
    %1 = memref.load %arg1[%0] : memref<1xi32, #tpu.memory_space<smem>>
    %2 = arith.index_cast %arg0 : i32 to index
    %3 = memref.load %arg2[%2] : memref<1xf32, #tpu.memory_space<smem>>
    %c0 = arith.constant 0 : index
    %c0_0 = arith.constant 0 : index
    %c0_1 = arith.constant 0 : index
    %4 = vector.load %arg3[%c0, %c0_0, %c0_1] : memref<1x128x128xf32, #tpu.memory_space<vmem>>, vector<1x128x128xf32>
    %5 = vector.shape_cast %4 : vector<1x128x128xf32> to vector<128x128xf32>
    %6 = tpu.iota {dimensions = array<i32: 0>} : vector<128x128xi32>
    %7 = tpu.iota {dimensions = array<i32: 1>} : vector<128x128xi32>
    %8 = vector.broadcast %3 : f32 to vector<128x128xf32>
    %9 = arith.cmpf ole, %5, %8 : vector<128x128xf32>
    %10 = arith.cmpi slt, %6, %7 : vector<128x128xi32>
    %11 = arith.andi %9, %10 : vector<128x128xi1>
    %12 = vector.broadcast %1 : i32 to vector<128x128xi32>
    %13 = arith.cmpi slt, %7, %12 : vector<128x128xi32>
    %14 = arith.andi %11, %13 : vector<128x128xi1>
    %cst = arith.constant 1.000000e+00 : f32
    %cst_2 = arith.constant 0.000000e+00 : f32
    %15 = vector.broadcast %cst : f32 to vector<128x128xf32>
    %16 = vector.broadcast %cst_2 : f32 to vector<128x128xf32>
    %17 = arith.select %14, %15, %16 : vector<128x128xi1>, vector<128x128xf32>
    %18 = tpu.transpose %17, [1, 0] : vector<128x128xf32> -> vector<128x128xf32>
    %19 = arith.addf %17, %18 : vector<128x128xf32>
    %c0_3 = arith.constant 0 : index
    %c0_4 = arith.constant 0 : index
    %c0_5 = arith.constant 0 : index
    %20 = vector.load %arg4[%c0_3, %c0_4, %c0_5] : memref<1x128x128xf32, #tpu.memory_space<vmem>>, vector<1x128x128xf32>
    %21 = vector.shape_cast %20 : vector<1x128x128xf32> to vector<128x128xf32>
    %22 = vector.shape_cast %19 : vector<128x128xf32> to vector<1x128x128xf32>
    tpu.vector_store %arg4[%c0_3, %c0_4, %c0_5], %22 {strides = array<i32>} : memref<1x128x128xf32, #tpu.memory_space<vmem>>, vector<1x128x128xf32>,
    return
  }
  func.func @transform_0(%arg0: i32) -> i32 {
    %c0_i32 = arith.constant 0 : i32
    %c0_i32_0 = arith.constant 0 : i32
    return %c0_i32 : i32
  }
  func.func @transform_1(%arg0: i32) -> i32 {
    %c0_i32 = arith.constant 0 : i32
    %c0_i32_0 = arith.constant 0 : i32
    return %c0_i32 : i32
  }
  func.func @transform_2(%arg0: i32) -> (i32, i32, i32) {
    %c0_i32 = arith.constant 0 : i32
    %c0_i32_0 = arith.constant 0 : i32
    %c0_i32_1 = arith.constant 0 : i32
    return %arg0, %c0_i32, %c0_i32_0 : i32, i32, i32
  }
  func.func @transform_3(%arg0: i32) -> (i32, i32, i32) {
    %c0_i32 = arith.constant 0 : i32
    %c0_i32_0 = arith.constant 0 : i32
    %c0_i32_1 = arith.constant 0 : i32
    return %arg0, %c0_i32, %c0_i32_0 : i32, i32, i32
  }
}

</mosaic_0001>

<bundles_post_ra>
// kernel: sample_dense_adj_batch.1
= control target key start
LH: loop header
LB: loop body
LE: loop exit
PB: predicated region body
PF: predicated region fallthrough
CT: control target
= control target key end

     0   :  { %v35_v1 = vlaneseq  ;;  %v245_v13 = vmov 0.0   ;;  %s488_s0 = inlined_call_operand.<no memory space> [shape: s32[1], index: 0, kind: input, shape index: {}]   ;;  %s489_s1 = inlined_call_operand.<no memory space> [shape: f32[1], index: 1, kind: input, shape index: {}]   ;;  %s490_s2 = inlined_call_operand.vmem [shape: f32[1,128,128], index: 2, kind: input, shape index: {}]   ;;  %s491_s3 = inlined_call_operand.hbm [shape: f32[1,128,128], index: 3, kind: output, shape index: {}]  }
   0x1   :  { %v19_v0 = vld [vmem:[%s490_s2] sm:$0xff]  ;;  %v275_v2 = vstv %s489_s1  ;;  %v20_v3 = vld [vmem:[%s490_s2 + $0x8] sm:$0xff]  ;;  %v103_v4 = vstv %s488_s0 }
   0x2   :  { %v283_v5 = vshrl.u32 %v35_v1, 7  ;;  %v285_v6 = vand.u32 127, %v35_v1  ;;  %vm55_vm0 = vcmp.le.f32.partialorder %v19_v0, %v275_v2  ;;  %vm56_vm1 = vcmp.le.f32.partialorder %v20_v3, %v275_v2  ;;  %v21_v7 = vld [vmem:[%s490_s2 + $0x10] sm:$0xff]  ;;  %v22_v11 = vld [vmem:[%s490_s2 + $0x18] sm:$0xff]  ;;  %v23_v17 = vld [vmem:[%s490_s2 + $0x20] sm:$0xff] }
   0x3   :  { %vm57_vm7 = vcmp.le.f32.partialorder %v21_v7, %v275_v2  ;;  %vm58_vm11 = vcmp.le.f32.partialorder %v22_v11, %v275_v2  ;;  %v24_v20 = vld [vmem:[%s490_s2 + $0x28] sm:$0xff]  ;;  %v25_v23 = vld [vmem:[%s490_s2 + $0x30] sm:$0xff]  ;;  %v26_v26 = vld [vmem:[%s490_s2 + $0x38] sm:$0xff] }
   0x4   :  { %vm71_vm2 = vcmp.lt.s32.totalorder %v283_v5, %v285_v6  ;;  %vm295_vm3 = vcmp.lt.s32.totalorder %v285_v6, %v103_v4  ;;  %v37_v9 = vadd.s32 8, %v283_v5  ;;  %v38_v10 = vadd.s32 16, %v283_v5  ;;  %v27_v29 = vld [vmem:[%s490_s2 + $0x40] sm:$0xff]  ;;  %v28_v32 = vld [vmem:[%s490_s2 + $0x48] sm:$0xff]  ;;  %v29_v35 = vld [vmem:[%s490_s2 + $0x50] sm:$0xff] }
   0x5   :  { %vm87_vm4 = vmand %vm55_vm0, %vm71_vm2  ;;  %v39_v12 = vadd.s32 24, %v283_v5  ;;  %v40_v15 = vadd.s32 32, %v283_v5  ;;  %vm59_vm0 = vcmp.le.f32.partialorder %v23_v17, %v275_v2  ;;  %v41_v18 = vadd.s32 40, %v283_v5  ;;  %v30_v38 = vld [vmem:[%s490_s2 + $0x58] sm:$0xff] }
   0x6   :  { %vm105_vm5 = vmand %vm87_vm4, %vm295_vm3  ;;  %vm72_vm6 = vcmp.lt.s32.totalorder %v37_v9, %v285_v6  ;;  %vm73_vm8 = vcmp.lt.s32.totalorder %v38_v10, %v285_v6  ;;  %v42_v21 = vadd.s32 48, %v283_v5  ;;  %v43_v24 = vadd.s32 56, %v283_v5 }
   0x7   :  { %v311_v14 = vsel %vm105_vm5, 1.0, %v245_v13  ;;  %vm88_vm9 = vmand %vm56_vm1, %vm72_vm6  ;;  %vm74_vm12 = vcmp.lt.s32.totalorder %v39_v12, %v285_v6  ;;  %vm75_vm1 = vcmp.lt.s32.totalorder %v40_v15, %v285_v6  ;;  %vm60_vm5 = vcmp.le.f32.partialorder %v24_v20, %v275_v2 }
   0x8   :  { %137 = vxpose.xlu0.b32.start [1/16] %v311_v14, 128  ;;  %vm106_vm10 = vmand %vm88_vm9, %vm295_vm3  ;;  %vm76_vm6 = vcmp.lt.s32.totalorder %v41_v18, %v285_v6  ;;  %vm61_vm9 = vcmp.le.f32.partialorder %v25_v23, %v275_v2  ;;  %v44_v27 = vadd.s32 64, %v283_v5  ;;  %v45_v30 = vadd.s32 72, %v283_v5 }
   0x9   :  { %v322_v16 = vsel %vm106_vm10, 1.0, %v245_v13  ;;  %vm89_vm13 = vmand %vm57_vm7, %vm73_vm8  ;;  %vm77_vm10 = vcmp.lt.s32.totalorder %v42_v21, %v285_v6  ;;  %v46_v33 = vadd.s32 80, %v283_v5  ;;  %v47_v36 = vadd.s32 88, %v283_v5 }
   0xa   :  { %vm107_vm14 = vmand %vm89_vm13, %vm295_vm3  ;;  %vm62_vm13 = vcmp.le.f32.partialorder %v26_v26, %v275_v2 }
   0xb   :  { %vm90_vm15 = vmand %vm58_vm11, %vm74_vm12  ;;  %v334_v19 = vsel %vm107_vm14, 1.0, %v245_v13  ;;  %vm78_vm14 = vcmp.lt.s32.totalorder %v43_v24, %v285_v6 }
   0xc   :  { %138 = vxpose.xlu0.b32.cont [2/16] %v322_v16, 128  ;;  %vm108_vm2 = vmand %vm90_vm15, %vm295_vm3 }
   0xd   :  { %vm91_vm4 = vmand %vm59_vm0, %vm75_vm1  ;;  %v346_v22 = vsel %vm108_vm2, 1.0, %v245_v13  ;;  %vm63_vm1 = vcmp.le.f32.partialorder %v27_v29, %v275_v2  ;;  %vm79_vm2 = vcmp.lt.s32.totalorder %v44_v27, %v285_v6 }
   0xe   :  { %vm109_vm7 = vmand %vm91_vm4, %vm295_vm3 }
   0xf   :  { %vm92_vm8 = vmand %vm60_vm5, %vm76_vm6  ;;  %v358_v25 = vsel %vm109_vm7, 1.0, %v245_v13  ;;  %vm64_vm6 = vcmp.le.f32.partialorder %v28_v32, %v275_v2  ;;  %vm80_vm7 = vcmp.lt.s32.totalorder %v45_v30, %v285_v6 }
  0x10   :  { %139 = vxpose.xlu0.b32.cont [3/16] %v334_v19, 128  ;;  %vm110_vm11 = vmand %vm92_vm8, %vm295_vm3 }
  0x11   :  { %vm93_vm12 = vmand %vm61_vm9, %vm77_vm10  ;;  %v370_v28 = vsel %vm110_vm11, 1.0, %v245_v13  ;;  %vm65_vm10 = vcmp.le.f32.partialorder %v29_v35, %v275_v2  ;;  %vm81_vm11 = vcmp.lt.s32.totalorder %v46_v33, %v285_v6 }
  0x12   :  { %vm111_vm15 = vmand %vm93_vm12, %vm295_vm3 }
  0x13   :  { %vm94_vm0 = vmand %vm62_vm13, %vm78_vm14  ;;  %v382_v31 = vsel %vm111_vm15, 1.0, %v245_v13 }
  0x14   :  { %140 = vxpose.xlu0.b32.cont [4/16] %v346_v22, 128  ;;  %vm112_vm4 = vmand %vm94_vm0, %vm295_vm3 }
  0x15   :  { %vm95_vm5 = vmand %vm63_vm1, %vm79_vm2  ;;  %v394_v34 = vsel %vm112_vm4, 1.0, %v245_v13 }
  0x16   :  { %vm113_vm8 = vmand %vm95_vm5, %vm295_vm3 }
  0x17   :  { %vm96_vm9 = vmand %vm64_vm6, %vm80_vm7  ;;  %v406_v37 = vsel %vm113_vm8, 1.0, %v245_v13 }
  0x18   :  { %141 = vxpose.xlu0.b32.cont [5/16] %v358_v25, 128 }
  0x1c   :  { %142 = vxpose.xlu0.b32.cont [6/16] %v370_v28, 128 }
  0x20   :  { %143 = vxpose.xlu0.b32.cont [7/16] %v382_v31, 128 }
  0x24   :  { %144 = vxpose.xlu0.b32.cont [8/16] %v394_v34, 128 }
  0x25   :  { %10 = vsyncpa [#allocation5], 0  ;;  %vm66_vm14 = vcmp.le.f32.partialorder %v30_v38, %v275_v2  ;;  %vm82_vm15 = vcmp.lt.s32.totalorder %v47_v36, %v285_v6  ;;  %v48_v39 = vadd.s32 96, %v283_v5  ;;  %v31_v41 = vld [vmem:[%s490_s2 + $0x60] sm:$0xff]  ;;  %v49_v42 = vadd.s32 104, %v283_v5  ;;  %v32_v44 = vld [vmem:[%s490_s2 + $0x68] sm:$0xff] }
  0x26   :  { %vm114_vm12 = vmand %vm96_vm9, %vm295_vm3  ;;  %vm67_vm2 = vcmp.le.f32.partialorder %v31_v41, %v275_v2  ;;  %vm68_vm7 = vcmp.le.f32.partialorder %v32_v44, %v275_v2  ;;  %v50_v45 = vadd.s32 112, %v283_v5  ;;  %v33_v47 = vld [vmem:[%s490_s2 + $0x70] sm:$0xff]  ;;  %v51_v48 = vadd.s32 120, %v283_v5  ;;  %v34_v50 = vld [vmem:[%s490_s2 + $0x78] sm:$0xff]  ;;  %s246_s2 = smov [#allocation4]  }
  0x27   :  { %vm97_vm13 = vmand %vm65_vm10, %vm81_vm11  ;;  %v418_v40 = vsel %vm114_vm12, 1.0, %v245_v13  ;;  %vm83_vm4 = vcmp.lt.s32.totalorder %v48_v39, %v285_v6  ;;  %vm84_vm8 = vcmp.lt.s32.totalorder %v49_v42, %v285_v6  ;;  %vm69_vm11 = vcmp.le.f32.partialorder %v33_v47, %v275_v2  ;;  %s206_s19 = sshll.u32 %s246_s2, 4  ;;  %s207_s19 = int_to_ptr.vmem [resolvable:$true] %s206_s19 }
  0x28   :  { %145 = vxpose.xlu0.b32.cont [9/16] %v406_v37, 128  ;;  %vm115_vm0 = vmand %vm97_vm13, %vm295_vm3  ;;  %vm85_vm12 = vcmp.lt.s32.totalorder %v50_v45, %v285_v6  ;;  %s221_s20 = scalar_lea.vmem %s207_s19, 2048  ;;  %p226_p1 = scmp.lt.s32.totalorder %s207_s19, %s207_s19 }
  0x29   :  { %vm98_vm1 = vmand %vm66_vm14, %vm82_vm15  ;;  %v430_v43 = vsel %vm115_vm0, 1.0, %v245_v13  ;;  %vm70_vm15 = vcmp.le.f32.partialorder %v34_v50, %v275_v2  ;;  %vm86_vm0 = vcmp.lt.s32.totalorder %v51_v48, %v285_v6  ;;  %p222_p0 = scmp.ne.s32.totalorder %s207_s19, %s221_s20  ;;  %p227_p2 = scmp.lt.s32.totalorder %s221_s20, %s221_s20 }
  0x2a   :  { %vm116_vm5 = vmand %vm98_vm1, %vm295_vm3 }
  0x2b   :  { %vm99_vm6 = vmand %vm67_vm2, %vm83_vm4  ;;  %v132_v46 = vsel %vm116_vm5, 1.0, %v245_v13  ;;  %p228_p3 = por %p227_p2, %p226_p1 }
  0x2c   :  { %146 = vxpose.xlu0.b32.cont [10/16] %v418_v40, 128  ;;  %vm117_vm9 = vmand %vm99_vm6, %vm295_vm3 }
  0x2d   :  { %vm100_vm10 = vmand %vm68_vm7, %vm84_vm8  ;;  %v133_v49 = vsel %vm117_vm9, 1.0, %v245_v13  ;;  %p229_p4 = pnand %p228_p3, %p222_p0 }
  0x2e   :  { %vm118_vm13 = vmand %vm100_vm10, %vm295_vm3 }
  0x2f   :  { %vm101_vm14 = vmand %vm69_vm11, %vm85_vm12  ;;  %v134_v51 = vsel %vm118_vm13, 1.0, %v245_v13 }
  0x30   :  { %147 = vxpose.xlu0.b32.cont [11/16] %v430_v43, 128  ;;  %vm119_vm1 = vmand %vm101_vm14, %vm295_vm3 }
  0x31   :  { %vm102_vm2 = vmand %vm70_vm15, %vm86_vm0  ;;  %v135_v52 = vsel %vm119_vm1, 1.0, %v245_v13 }
  0x32   :  { %vm120_vm4 = vmand %vm102_vm2, %vm295_vm3 }
  0x33   :  { %v136_v53 = vsel %vm120_vm4, 1.0, %v245_v13 }
  0x34   :  { %148 = vxpose.xlu0.b32.cont [12/16] %v132_v46, 128 }
  0x38   :  { %149 = vxpose.xlu0.b32.cont [13/16] %v133_v49, 128 }
  0x3c   :  { %150 = vxpose.xlu0.b32.cont [14/16] %v134_v51, 128 }
  0x40   :  { %151 = vxpose.xlu0.b32.cont [15/16] %v135_v52, 128 }
  0x44   :  { %152 = vxpose.xlu0.b32.end [16/16] %v136_v53, 128 }
  0x88   :  { %v153_v54 = vpop.trf.xlu0 }
  0x89   :  { %v169_v55 = vadd.f32 %v153_v54, %v311_v14 }
  0x8b   :  { %185 = vst [vmem:[#allocation4] sm:$0xff] %v169_v55 }
  0x8c   :  { %v154_v56 = vpop.trf.xlu0 }
  0x8d   :  { %v170_v57 = vadd.f32 %v154_v56, %v322_v16 }
  0x8f   :  { %186 = vst [vmem:[#allocation4 + $0x8] sm:$0xff] %v170_v57 }
  0x90   :  { %v155_v58 = vpop.trf.xlu0 }
  0x91   :  { %v171_v59 = vadd.f32 %v155_v58, %v334_v19 }
  0x93   :  { %187 = vst [vmem:[#allocation4 + $0x10] sm:$0xff] %v171_v59 }
  0x94   :  { %v156_v60 = vpop.trf.xlu0 }
  0x95   :  { %v172_v61 = vadd.f32 %v156_v60, %v346_v22 }
  0x97   :  { %188 = vst [vmem:[#allocation4 + $0x18] sm:$0xff] %v172_v61 }
  0x98   :  { %v157_v62 = vpop.trf.xlu0 }
  0x99   :  { %v173_v63 = vadd.f32 %v157_v62, %v358_v25 }
  0x9b   :  { %189 = vst [vmem:[#allocation4 + $0x20] sm:$0xff] %v173_v63 }
  0x9c   :  { %v158_v0 = vpop.trf.xlu0 }
  0x9d   :  { %v174_v1 = vadd.f32 %v158_v0, %v370_v28 }
  0x9f   :  { %190 = vst [vmem:[#allocation4 + $0x28] sm:$0xff] %v174_v1 }
  0xa0   :  { %v159_v2 = vpop.trf.xlu0 }
  0xa1   :  { %v175_v3 = vadd.f32 %v159_v2, %v382_v31 }
  0xa3   :  { %191 = vst [vmem:[#allocation4 + $0x30] sm:$0xff] %v175_v3 }
  0xa4   :  { %v160_v4 = vpop.trf.xlu0 }
  0xa5   :  { %v176_v5 = vadd.f32 %v160_v4, %v394_v34 }
  0xa7   :  { %192 = vst [vmem:[#allocation4 + $0x38] sm:$0xff] %v176_v5 }
  0xa8   :  { %v161_v6 = vpop.trf.xlu0 }
  0xa9   :  { %v177_v7 = vadd.f32 %v161_v6, %v406_v37 }
  0xab   :  { %193 = vst [vmem:[#allocation4 + $0x40] sm:$0xff] %v177_v7 }
  0xac   :  { %v162_v8 = vpop.trf.xlu0 }
  0xad   :  { %v178_v9 = vadd.f32 %v162_v8, %v418_v40 }
  0xaf   :  { %194 = vst [vmem:[#allocation4 + $0x48] sm:$0xff] %v178_v9 }
  0xb0   :  { %v163_v10 = vpop.trf.xlu0 }
  0xb1   :  { %v179_v11 = vadd.f32 %v163_v10, %v430_v43 }
  0xb3   :  { %195 = vst [vmem:[#allocation4 + $0x50] sm:$0xff] %v179_v11 }
  0xb4   :  { %v164_v12 = vpop.trf.xlu0 }
  0xb5   :  { %v180_v13 = vadd.f32 %v164_v12, %v132_v46 }
  0xb7   :  { %196 = vst [vmem:[#allocation4 + $0x58] sm:$0xff] %v180_v13 }
  0xb8   :  { %v165_v14 = vpop.trf.xlu0 }
  0xb9   :  { %v181_v15 = vadd.f32 %v165_v14, %v133_v49 }
  0xbb   :  { %197 = vst [vmem:[#allocation4 + $0x60] sm:$0xff] %v181_v15 }
  0xbc   :  { %v166_v16 = vpop.trf.xlu0 }
  0xbd   :  { %v182_v17 = vadd.f32 %v166_v16, %v134_v51 }
  0xbf   :  { %198 = vst [vmem:[#allocation4 + $0x68] sm:$0xff] %v182_v17 }
  0xc0   :  { %v167_v18 = vpop.trf.xlu0 }
  0xc1   :  { %v183_v19 = vadd.f32 %v167_v18, %v135_v52 }
  0xc3   :  { %199 = vst [vmem:[#allocation4 + $0x70] sm:$0xff] %v183_v19 }
  0xc4   :  { %v168_v20 = vpop.trf.xlu0 }
  0xc5   :  { %v184_v21 = vadd.f32 %v168_v20, %v136_v53 }
  0xc7   :  { %200 = vst [vmem:[#allocation4 + $0x78] sm:$0xff] %v184_v21 }
  0xc8   :  { %232 = shalt.err (!%p229_p4)
}
  0xc9   :  { %s233_s1 = scalar_lea.hbm %s491_s3, 2048 }
  0xca   :  { %p234_p5 = scmp.ne.s32.totalorder %s491_s3, %s233_s1  ;;  %p237_p6 = scmp.lt.u32.totalorder %s233_s1, %s491_s3 }
  0xcc   :  { %p239_p7 = pnand %p237_p6, %p234_p5 }
  0xce   :  { %242 = shalt.err (!%p239_p7)
}
  0xcf   :  { %s247_s26 = smov 128   ;;  %s248_s27 = smov 8  }
  0xd0   :  { %212 = dma.vmem_to_hbm [thread:$0]  %s207_s19, 2048, %s491_s3, [#allocation5], %s247_s26, %s247_s26, %s248_s27  }
  0xd1   :  { %243 = dma.done.wait [#allocation5], 2048  }
  0xd2   :  { %244 = vsyncadd [#allocation5], 4294965248 }
  0xd3   :  { %216 = vsyncpa [#allocation5], 1 }

</bundles_post_ra>
